<compile_context>
chip_gen: v7x
topology: tpu7x:2x2x1
jax: 0.10.0
libtpu: 0.0.40
codegen_flags: <defaults>
</compile_context>

<pallas_src>
import functools

import jax
import jax.numpy as jnp
from jax.experimental import pallas as pl
from jax.experimental.pallas import tpu as pltpu

LOG_STD_MIN = -20.0
LOG_STD_MAX = 2.0
LANE = 128
TILE_MULT = 16  # bf16 packs 16 sublanes/vreg; also a multiple of the f32 rule (8)


def _round_up(x, m):
    return ((x + m - 1) // m) * m


def _cdiv(a, b):
    return (a + b - 1) // b


# --------------------------------------------------------------------------
# Kernel: one batch tile -> fused 2-layer MLP encoder + fused Normal head.
# Output is a single lane-dense block [loc | scale] of width 2*a_pad.
# --------------------------------------------------------------------------
def _policy_params_kernel(obs_ref, w1_ref, b1_ref, w2_ref, b2_ref,
                          wh_ref, bh_ref, out_ref):
    cdt = w1_ref.dtype
    # In-kernel cast of the raw f32 obs tile (free VPU filler).
    x = obs_ref[...].astype(cdt)

    # Encoder: two fully-connected layers with ReLU (f32 accumulate on MXU).
    h = jnp.dot(x, w1_ref[...], preferred_element_type=jnp.float32)
    h = jnp.maximum(h + b1_ref[...], 0.0)
    h = jnp.dot(h.astype(cdt), w2_ref[...], preferred_element_type=jnp.float32)
    h = jnp.maximum(h + b2_ref[...], 0.0)

    # Fused Normal-params head: one MXU pass yields [loc | log_scale].
    head = jnp.dot(h.astype(cdt), wh_ref[...],
                   preferred_element_type=jnp.float32) + bh_ref[...]
    split = out_ref.shape[1] // 2          # 128-aligned -> lane-aligned slices
    log_scale = jnp.clip(head[:, split:], LOG_STD_MIN, LOG_STD_MAX)

    out_ref[:, :split] = head[:, :split].astype(out_ref.dtype)
    out_ref[:, split:] = jnp.exp(log_scale).astype(out_ref.dtype)


# --------------------------------------------------------------------------
# Host-side param prep: pad output feature dims to 128 (NOT the obs rows of
# w1, so raw obs can be fed directly), fuse the two heads, cast matmul
# operands to the compute dtype. Biases stay f32 (f32 epilogue on all chips).
# --------------------------------------------------------------------------
def prepare_policy_params(params, compute_dtype=jnp.bfloat16):
    obs_dim, hidden = params["w1"].shape
    action_dim = params["w_loc"].shape[1]
    h_pad = _round_up(hidden, LANE)
    a_pad = _round_up(action_dim, LANE)

    def pad2(w, rows, cols):
        return jnp.pad(w, ((0, rows - w.shape[0]), (0, cols - w.shape[1])))

    w1 = pad2(params["w1"], obs_dim, h_pad).astype(compute_dtype)
    w2 = pad2(params["w2"], h_pad, h_pad).astype(compute_dtype)
    w_head = jnp.concatenate(
        [pad2(params["w_loc"], h_pad, a_pad),
         pad2(params["w_ls"], h_pad, a_pad)], axis=1).astype(compute_dtype)

    b1 = pad2(params["b1"], 1, h_pad).astype(jnp.float32)
    b2 = pad2(params["b2"], 1, h_pad).astype(jnp.float32)
    b_head = jnp.concatenate(
        [pad2(params["b_loc"], 1, a_pad),
         pad2(params["b_ls"], 1, a_pad)], axis=1).astype(jnp.float32)

    cparams = dict(w1=w1, b1=b1, w2=w2, b2=b2, w_head=w_head, b_head=b_head)
    meta = dict(obs_dim=obs_dim, action_dim=action_dim, h_pad=h_pad, a_pad=a_pad)
    return cparams, meta


def _choose_tb(batch, tb_target):
    """Batch tile: multiple of 16, <= ~tb_target rows, >= 2 grid steps whenever
    the batch can be split (so v7x's two TensorCores both get work), and
    padding waste bounded to < 1 tile."""
    n_tiles = max(1, _cdiv(batch, tb_target))
    if n_tiles == 1 and batch > TILE_MULT:
        n_tiles = 2
    return _round_up(_cdiv(batch, n_tiles), TILE_MULT)


def _vmem_limit_bytes(tb, obs_dim, h_pad, head_w, cparams, out_itemsize):
    in_block = tb * obs_dim * 4                     # raw f32 obs tile
    out_block = tb * head_w * out_itemsize          # fused [loc|scale] tile
    weights = sum(int(v.size) * v.dtype.itemsize for v in cparams.values())
    interm = 3 * tb * max(h_pad, head_w) * 4        # f32 activations/accumulators
    total = 2 * (in_block + out_block) + 2 * weights + interm
    # Generous headroom, clamped to v7x's 64 MiB physical VMEM per TensorCore.
    # NOTE: constants could also be single-buffered via pl.Buffered(1) if
    # hidden sizes ever grow enough to pressure v7x VMEM; negligible today.
    return int(min(max(total + (8 << 20), 16 << 20), 64 << 20))


# --------------------------------------------------------------------------
# Wrapper: grid over batch, weights resident in VMEM across grid steps.
# --------------------------------------------------------------------------
def stochastic_policy_forward(obs, cparams, *, action_dim, a_pad,
                              tb_target=512, return_padded=False):
    """forward(obs) of the stochastic policy. Returns (loc, scale).

    With return_padded=True the raw fused kernel output of shape (B, 2*a_pad)
    = [loc_pad | scale_pad] is returned so downstream consumers can skip the
    lane slice (padded loc lanes are 0, padded scale lanes are exp(0) = 1).
    """
    batch, obs_dim = obs.shape
    h_pad = cparams["w2"].shape[0]
    head_w = cparams["w_head"].shape[1]       # == 2 * a_pad
    out_dtype = cparams["w1"].dtype           # emit in the compute dtype

    tb = _choose_tb(batch, tb_target)
    grid = (_cdiv(batch, tb),)                # ragged last tile handled by Pallas

    def const(arr):  # whole array, same block every grid step -> VMEM-resident
        nd = arr.ndim
        return pl.BlockSpec(arr.shape, lambda i: (0,) * nd)

    out_itemsize = jnp.dtype(out_dtype).itemsize
    flops = 2 * batch * (obs_dim * h_pad + h_pad * h_pad + h_pad * head_w)
    bytes_accessed = (
        obs.size * obs.dtype.itemsize
        + sum(int(v.size) * v.dtype.itemsize for v in cparams.values())
        + batch * head_w * out_itemsize)

    fused = pl.pallas_call(
        _policy_params_kernel,
        out_shape=jax.ShapeDtypeStruct((batch, head_w), out_dtype),
        grid=grid,
        in_specs=[
            pl.BlockSpec((tb, obs_dim), lambda i: (i, 0)),
            const(cparams["w1"]), const(cparams["b1"]),
            const(cparams["w2"]), const(cparams["b2"]),
            const(cparams["w_head"]), const(cparams["b_head"]),
        ],
        out_specs=pl.BlockSpec((tb, head_w), lambda i: (i, 0)),
        compiler_params=pltpu.CompilerParams(
            dimension_semantics=("parallel",),
            vmem_limit_bytes=_vmem_limit_bytes(
                tb, obs_dim, h_pad, head_w, cparams, out_itemsize)),
        cost_estimate=pl.CostEstimate(
            flops=int(flops),
            transcendentals=int(batch * a_pad),
            bytes_accessed=int(bytes_accessed)),
    )(obs, cparams["w1"], cparams["b1"], cparams["w2"], cparams["b2"],
      cparams["w_head"], cparams["b_head"])

    if return_padded:
        return fused
    return fused[:, :action_dim], fused[:, a_pad:a_pad + action_dim]


# --------------------------------------------------------------------------
# Reference + test harness.
# --------------------------------------------------------------------------
def init_params(key, obs_dim, hidden, action_dim):
    ks = jax.random.split(key, 5)
    s = 0.1
    return {
        "w1": s * jax.random.normal(ks[0], (obs_dim, hidden), jnp.float32),
        "b1": jnp.zeros((1, hidden), jnp.float32),
        "w2": s * jax.random.normal(ks[1], (hidden, hidden), jnp.float32),
        "b2": jnp.zeros((1, hidden), jnp.float32),
        "w_loc": s * jax.random.normal(ks[2], (hidden, action_dim), jnp.float32),
        "b_loc": jnp.zeros((1, action_dim), jnp.float32),
        "w_ls": s * jax.random.normal(ks[3], (hidden, action_dim), jnp.float32),
        "b_ls": jnp.zeros((1, action_dim), jnp.float32),
    }


def _reference(obs, p):
    h = jnp.maximum(obs @ p["w1"] + p["b1"], 0.0)
    h = jnp.maximum(h @ p["w2"] + p["b2"], 0.0)
    loc = h @ p["w_loc"] + p["b_loc"]
    log_scale = jnp.clip(h @ p["w_ls"] + p["b_ls"], LOG_STD_MIN, LOG_STD_MAX)
    return loc, jnp.exp(log_scale)


def _make_forward(params, compute_dtype, tb_target=512):
    cparams, meta = prepare_policy_params(params, compute_dtype=compute_dtype)
    fwd = jax.jit(functools.partial(
        stochastic_policy_forward,
        action_dim=meta["action_dim"],
        a_pad=meta["a_pad"],
        tb_target=tb_target))
    return fwd, cparams


if __name__ == "__main__":
    OBS_DIM, HIDDEN, ACT_DIM = 16, 32, 4
    key = jax.random.PRNGKey(0)
    k_obs, k_obs2, k_par = jax.random.split(key, 3)
    params = init_params(k_par, OBS_DIM, HIDDEN, ACT_DIM)

    # --- f32 compute path, small batch: exact match against the reference ---
    B = 4
    obs = jax.random.normal(k_obs, (B, OBS_DIM), jnp.float32)
    ref_loc, ref_scale = _reference(obs, params)

    fwd_f32, cp_f32 = _make_forward(params, jnp.float32)
    loc, scale = fwd_f32(obs, cp_f32)
    jax.block_until_ready((loc, scale))
    assert loc.shape == (B, ACT_DIM) and scale.shape == (B, ACT_DIM)
    assert jnp.allclose(loc, ref_loc, atol=1e-5), "f32 loc mismatch"
    assert jnp.allclose(scale, ref_scale, atol=1e-5), "f32 scale mismatch"

    # --- bf16 compute path (MXU-native), ragged multi-tile batch (grid=2) ---
    B2 = 37
    obs2 = jax.random.normal(k_obs2, (B2, OBS_DIM), jnp.float32)
    ref_loc2, ref_scale2 = _reference(obs2, params)

    fwd_bf16, cp_bf16 = _make_forward(params, jnp.bfloat16, tb_target=32)
    loc2, scale2 = fwd_bf16(obs2, cp_bf16)
    jax.block_until_ready((loc2, scale2))
    assert loc2.shape == (B2, ACT_DIM) and scale2.shape == (B2, ACT_DIM)
    assert jnp.allclose(loc2.astype(jnp.float32), ref_loc2,
                        atol=2e-2, rtol=2e-2), "bf16 loc mismatch"
    assert jnp.allclose(scale2.astype(jnp.float32), ref_scale2,
                        atol=2e-2, rtol=2e-2), "bf16 scale mismatch"

    print("KERNEL_OK")
</pallas_src>

<mosaic_0001>
module attributes {stable_mosaic.version = 11 : i64} {
  func.func @_policy_params_kernel(%arg0: i32, %arg1: memref<16x16xf32, #tpu.memory_space<vmem>>, %arg2: memref<16x128xf32, #tpu.memory_space<vmem>>, %arg3: memref<1x128xf32, #tpu.memory_space<vmem>>, %arg4: memref<128x128xf32, #tpu.memory_space<vmem>>, %arg5: memref<1x128xf32, #tpu.memory_space<vmem>>, %arg6: memref<128x256xf32, #tpu.memory_space<vmem>>, %arg7: memref<1x256xf32, #tpu.memory_space<vmem>>, %arg8: memref<16x256xf32, #tpu.memory_space<vmem>>) attributes {dimension_semantics = [#tpu.dimension_semantics<parallel>], iteration_bounds = array<i64: 1>, scalar_prefetch = 0 : i64, scratch_operands = 0 : i64, tpu.core_type = #tpu.core_type<tc>, window_params = [{transform_indices = @transform_0, window_bounds = array<i64: 16, 16>}, {pipeline_mode = #tpu.pipeline_mode<synchronous>, transform_indices = @transform_1, window_bounds = array<i64: 16, 128>}, {pipeline_mode = #tpu.pipeline_mode<synchronous>, transform_indices = @transform_2, window_bounds = array<i64: 1, 128>}, {pipeline_mode = #tpu.pipeline_mode<synchronous>, transform_indices = @transform_3, window_bounds = array<i64: 128, 128>}, {pipeline_mode = #tpu.pipeline_mode<synchronous>, transform_indices = @transform_4, window_bounds = array<i64: 1, 128>}, {pipeline_mode = #tpu.pipeline_mode<synchronous>, transform_indices = @transform_5, window_bounds = array<i64: 128, 256>}, {pipeline_mode = #tpu.pipeline_mode<synchronous>, transform_indices = @transform_6, window_bounds = array<i64: 1, 256>}, {transform_indices = @transform_7, window_bounds = array<i64: 16, 256>}]} {
    %c0 = arith.constant 0 : index
    %c0_0 = arith.constant 0 : index
    %0 = vector.load %arg1[%c0, %c0_0] : memref<16x16xf32, #tpu.memory_space<vmem>>, vector<16x16xf32>
    %c0_1 = arith.constant 0 : index
    %c0_2 = arith.constant 0 : index
    %1 = vector.load %arg2[%c0_1, %c0_2] : memref<16x128xf32, #tpu.memory_space<vmem>>, vector<16x128xf32>
    %cst = arith.constant dense<0.000000e+00> : vector<16x128xf32>
    %2 = tpu.matmul %0, %1, %cst {dimension_numbers = #tpu.dot_dimension_numbers<[1], [0], [0], [1], [0, 0, 1, 1], [], []>} : vector<16x16xf32>, vector<16x128xf32>, vector<16x128xf32> -> vector<16x128xf32>
    %c0_3 = arith.constant 0 : index
    %c0_4 = arith.constant 0 : index
    %3 = vector.load %arg3[%c0_3, %c0_4] : memref<1x128xf32, #tpu.memory_space<vmem>>, vector<1x128xf32>
    %4 = vector.broadcast %3 : vector<1x128xf32> to vector<16x128xf32>
    %5 = arith.addf %2, %4 : vector<16x128xf32>
    %cst_5 = arith.constant 0.000000e+00 : f32
    %6 = vector.broadcast %cst_5 : f32 to vector<16x128xf32>
    %7 = arith.maximumf %5, %6 : vector<16x128xf32>
    %c0_6 = arith.constant 0 : index
    %c0_7 = arith.constant 0 : index
    %8 = vector.load %arg4[%c0_6, %c0_7] : memref<128x128xf32, #tpu.memory_space<vmem>>, vector<128x128xf32>
    %cst_8 = arith.constant dense<0.000000e+00> : vector<16x128xf32>
    %9 = tpu.matmul %7, %8, %cst_8 {dimension_numbers = #tpu.dot_dimension_numbers<[1], [0], [0], [1], [0, 0, 1, 1], [], []>} : vector<16x128xf32>, vector<128x128xf32>, vector<16x128xf32> -> vector<16x128xf32>
    %c0_9 = arith.constant 0 : index
    %c0_10 = arith.constant 0 : index
    %10 = vector.load %arg5[%c0_9, %c0_10] : memref<1x128xf32, #tpu.memory_space<vmem>>, vector<1x128xf32>
    %11 = vector.broadcast %10 : vector<1x128xf32> to vector<16x128xf32>
    %12 = arith.addf %9, %11 : vector<16x128xf32>
    %cst_11 = arith.constant 0.000000e+00 : f32
    %13 = vector.broadcast %cst_11 : f32 to vector<16x128xf32>
    %14 = arith.maximumf %12, %13 : vector<16x128xf32>
    %c0_12 = arith.constant 0 : index
    %c0_13 = arith.constant 0 : index
    %15 = vector.load %arg6[%c0_12, %c0_13] : memref<128x256xf32, #tpu.memory_space<vmem>>, vector<128x256xf32>
    %cst_14 = arith.constant dense<0.000000e+00> : vector<16x256xf32>
    %16 = tpu.matmul %14, %15, %cst_14 {dimension_numbers = #tpu.dot_dimension_numbers<[1], [0], [0], [1], [0, 0, 1, 1], [], []>} : vector<16x128xf32>, vector<128x256xf32>, vector<16x256xf32> -> vector<16x256xf32>
    %c0_15 = arith.constant 0 : index
    %c0_16 = arith.constant 0 : index
    %17 = vector.load %arg7[%c0_15, %c0_16] : memref<1x256xf32, #tpu.memory_space<vmem>>, vector<1x256xf32>
    %18 = vector.broadcast %17 : vector<1x256xf32> to vector<16x256xf32>
    %19 = arith.addf %16, %18 : vector<16x256xf32>
    %20 = vector.extract_strided_slice %19 {offsets = [0, 128], sizes = [16, 128], strides = [1, 1]} : vector<16x256xf32> to vector<16x128xf32>
    %cst_17 = arith.constant -2.000000e+01 : f32
    %cst_18 = arith.constant 2.000000e+00 : f32
    %21 = vector.broadcast %cst_17 : f32 to vector<16x128xf32>
    %22 = arith.maximumf %21, %20 : vector<16x128xf32>
    %23 = vector.broadcast %cst_18 : f32 to vector<16x128xf32>
    %24 = arith.minimumf %23, %22 : vector<16x128xf32>
    %25 = vector.extract_strided_slice %19 {offsets = [0, 0], sizes = [16, 128], strides = [1, 1]} : vector<16x256xf32> to vector<16x128xf32>
    %c0_19 = arith.constant 0 : index
    %c0_20 = arith.constant 0 : index
    %26 = vector.load %arg8[%c0_19, %c0_20] : memref<16x256xf32, #tpu.memory_space<vmem>>, vector<16x128xf32>
    tpu.vector_store %arg8[%c0_19, %c0_20], %25 {strides = array<i32>} : memref<16x256xf32, #tpu.memory_space<vmem>>, vector<16x128xf32>,
    %27 = math.exp %24 : vector<16x128xf32>
    %c0_21 = arith.constant 0 : index
    %c128 = arith.constant 128 : index
    %28 = vector.load %arg8[%c0_21, %c128] : memref<16x256xf32, #tpu.memory_space<vmem>>, vector<16x128xf32>
    tpu.vector_store %arg8[%c0_21, %c128], %27 {strides = array<i32>} : memref<16x256xf32, #tpu.memory_space<vmem>>, vector<16x128xf32>,
    return
  }
  func.func @transform_0(%arg0: i32) -> (i32, i32) {
    %c0_i32 = arith.constant 0 : i32
    %c0_i32_0 = arith.constant 0 : i32
    return %arg0, %c0_i32 : i32, i32
  }
  func.func @transform_1(%arg0: i32) -> (i32, i32) {
    %c0_i32 = arith.constant 0 : i32
    %c0_i32_0 = arith.constant 0 : i32
    %c0_i32_1 = arith.constant 0 : i32
    return %c0_i32, %c0_i32_0 : i32, i32
  }
  func.func @transform_2(%arg0: i32) -> (i32, i32) {
    %c0_i32 = arith.constant 0 : i32
    %c0_i32_0 = arith.constant 0 : i32
    %c0_i32_1 = arith.constant 0 : i32
    return %c0_i32, %c0_i32_0 : i32, i32
  }
  func.func @transform_3(%arg0: i32) -> (i32, i32) {
    %c0_i32 = arith.constant 0 : i32
    %c0_i32_0 = arith.constant 0 : i32
    %c0_i32_1 = arith.constant 0 : i32
    return %c0_i32, %c0_i32_0 : i32, i32
  }
  func.func @transform_4(%arg0: i32) -> (i32, i32) {
    %c0_i32 = arith.constant 0 : i32
    %c0_i32_0 = arith.constant 0 : i32
    %c0_i32_1 = arith.constant 0 : i32
    return %c0_i32, %c0_i32_0 : i32, i32
  }
  func.func @transform_5(%arg0: i32) -> (i32, i32) {
    %c0_i32 = arith.constant 0 : i32
    %c0_i32_0 = arith.constant 0 : i32
    %c0_i32_1 = arith.constant 0 : i32
    return %c0_i32, %c0_i32_0 : i32, i32
  }
  func.func @transform_6(%arg0: i32) -> (i32, i32) {
    %c0_i32 = arith.constant 0 : i32
    %c0_i32_0 = arith.constant 0 : i32
    %c0_i32_1 = arith.constant 0 : i32
    return %c0_i32, %c0_i32_0 : i32, i32
  }
  func.func @transform_7(%arg0: i32) -> (i32, i32) {
    %c0_i32 = arith.constant 0 : i32
    %c0_i32_0 = arith.constant 0 : i32
    return %arg0, %c0_i32 : i32, i32
  }
}

</mosaic_0001>

<bundles_post_ra>
// kernel: stochastic_policy_forward.1
= control target key start
LH: loop header
LB: loop body
LE: loop exit
PB: predicated region body
PF: predicated region fallthrough
CT: control target
= control target key end

     0   :  { %12 = vsyncpa [#allocation3], 0  ;;  %s839_s0 = inlined_call_operand.hbm [shape: f32[4,16], index: 0, kind: input, shape index: {}]   ;;  %s840_s1 = inlined_call_operand.hbm [shape: f32[16,128], index: 1, kind: input, shape index: {}]   ;;  %s841_s2 = inlined_call_operand.vmem [shape: f32[1,128], index: 2, kind: input, shape index: {}]   ;;  %s842_s3 = inlined_call_operand.hbm [shape: f32[128,128], index: 3, kind: input, shape index: {}]   ;;  %s843_s4 = inlined_call_operand.vmem [shape: f32[1,128], index: 4, kind: input, shape index: {}]   ;;  %s844_s5 = inlined_call_operand.hbm [shape: f32[128,256], index: 5, kind: input, shape index: {}]   ;;  %s845_s6 = inlined_call_operand.vmem [shape: f32[1,256], index: 6, kind: input, shape index: {}]   ;;  %s846_s7 = inlined_call_operand.vmem [shape: f32[4,256], index: 7, kind: output, shape index: {}]  }
   0x1   :  { %13 = vsyncpa [#allocation5], 0 }
   0x2   :  { %14 = vsyncpa [#allocation8], 0 }
   0x3   :  { %19 = vsyncadd [#allocation3], 192  ;;  %s713_s24 = smov [#allocation4]   ;;  %s619_s28 = scalar_lea.hbm %s840_s1, 256 }
   0x4   :  { %s32_s25 = sshll.u32 %s713_s24, 4  ;;  %p620_p0 = scmp.ne.s32.totalorder %s840_s1, %s619_s28  ;;  %s33_s25 = int_to_ptr.vmem [resolvable:$true] %s32_s25 }
   0x5   :  { %p623_p1 = scmp.lt.u32.totalorder %s619_s28, %s840_s1 }
   0x7   :  { %p625_p2 = pnand %p623_p1, %p620_p0 }
   0x9   :  { %628 = shalt.err (!%p625_p2)
}
   0xa   :  { %s629_s10 = scalar_lea.vmem %s33_s25, 256  ;;  %p634_p4 = scmp.lt.s32.totalorder %s33_s25, %s33_s25 }
   0xb   :  { %p630_p3 = scmp.ne.s32.totalorder %s33_s25, %s629_s10  ;;  %p635_p5 = scmp.lt.s32.totalorder %s629_s10, %s629_s10 }
   0xd   :  { %p636_p6 = por %p635_p5, %p634_p4 }
   0xf   :  { %p637_p7 = pnand %p636_p6, %p630_p3 }
  0x11   :  { %640 = shalt.err (!%p637_p7)
}
  0x12   :  { %s714_s11 = smov 128   ;;  %s715_s12 = smov 8  }
  0x13   :  { %38 = dma.hbm_to_vmem [thread:$0]  %s840_s1, 256, %s33_s25, [#allocation5], %s714_s11, %s714_s11, %s715_s12  }
  0x14   :  { %s716_s15 = smov [#allocation2]   ;;  %s641_s19 = scalar_lea.hbm %s839_s0, 64 }
  0x15   :  { %s20_s16 = sshll.u32 %s716_s15, 4  ;;  %p642_p8 = scmp.ne.s32.totalorder %s839_s0, %s641_s19  ;;  %s21_s16 = int_to_ptr.vmem [resolvable:$true] %s20_s16 }
  0x16   :  { %p645_p9 = scmp.lt.u32.totalorder %s641_s19, %s839_s0 }
  0x18   :  { %p647_p10 = pnand %p645_p9, %p642_p8 }
  0x1a   :  { %650 = shalt.err (!%p647_p10)
}
  0x1b   :  { %s651_s24 = scalar_lea.vmem %s21_s16, 64  ;;  %s655_s1 = scalar_lea.vmem %s21_s16, 256 }
  0x1c   :  { %p652_p11 = scmp.ne.s32.totalorder %s21_s16, %s651_s24  ;;  %p656_p12 = scmp.lt.s32.totalorder %s21_s16, %s21_s16 }
  0x1d   :  { %p657_p13 = scmp.lt.s32.totalorder %s655_s1, %s651_s24 }
  0x1f   :  { %p658_p0 = por %p657_p13, %p656_p12 }
  0x21   :  { %p659_p1 = pnand %p658_p0, %p652_p11 }
  0x23   :  { %662 = shalt.err (!%p659_p1)
}
  0x24   :  { %s717_s25 = smov 64   ;;  %s718_s26 = smov 4  }
  0x25   :  { %26 = dma.hbm_to_vmem [thread:$0]  %s839_s0, 64, %s21_s16, [#allocation3], %s717_s25, %s717_s25, %s718_s26  }
  0x26   :  { %s719_s29 = smov [#allocation6]   ;;  %s720_s8 = smov [#allocation7]  }
  0x27   :  { %s46_s30 = sshll.u32 %s719_s29, 4  ;;  %s60_s9 = sshll.u32 %s720_s8, 4  ;;  %s47_s30 = int_to_ptr.vmem [resolvable:$true] %s46_s30  ;;  %s791_s9 = int_to_ptr.vmem [resolvable:$true] %s60_s9 }
  0x28   :  { %s663_s14 = scalar_lea.hbm %s842_s3, 2048 }
  0x29   :  { %p664_p2 = scmp.ne.s32.totalorder %s842_s3, %s663_s14  ;;  %p667_p3 = scmp.lt.u32.totalorder %s663_s14, %s842_s3 }
  0x2b   :  { %p669_p4 = pnand %p667_p3, %p664_p2 }
  0x2d   :  { %672 = shalt.err (!%p669_p4)
}
  0x2e   :  { %s673_s0 = scalar_lea.vmem %s47_s30, 2048  ;;  %p678_p6 = scmp.lt.s32.totalorder %s47_s30, %s47_s30 }
  0x2f   :  { %p674_p5 = scmp.ne.s32.totalorder %s47_s30, %s673_s0  ;;  %p679_p7 = scmp.lt.s32.totalorder %s673_s0, %s673_s0 }
  0x31   :  { %p680_p8 = por %p679_p7, %p678_p6 }
  0x33   :  { %p681_p9 = pnand %p680_p8, %p674_p5 }
  0x35   :  { %684 = shalt.err (!%p681_p9)
}
  0x36   :  { %52 = dma.hbm_to_vmem [thread:$0]  %s842_s3, 2048, %s47_s30, [#allocation5], %s714_s11, %s714_s11, %s715_s12  }
  0x37   :  { %s685_s23 = scalar_lea.hbm %s844_s5, 4096 }
  0x38   :  { %p686_p10 = scmp.ne.s32.totalorder %s844_s5, %s685_s23  ;;  %p689_p11 = scmp.lt.u32.totalorder %s685_s23, %s844_s5 }
  0x3a   :  { %p691_p12 = pnand %p689_p11, %p686_p10 }
  0x3c   :  { %694 = shalt.err (!%p691_p12)
}
  0x3d   :  { %s695_s27 = scalar_lea.vmem %s791_s9, 4096  ;;  %p700_p0 = scmp.lt.s32.totalorder %s791_s9, %s791_s9 }
  0x3e   :  { %p696_p13 = scmp.ne.s32.totalorder %s791_s9, %s695_s27  ;;  %p701_p1 = scmp.lt.s32.totalorder %s695_s27, %s695_s27 }
  0x40   :  { %p702_p2 = por %p701_p1, %p700_p0 }
  0x42   :  { %p703_p3 = pnand %p702_p2, %p696_p13 }
  0x44   :  { %706 = shalt.err (!%p703_p3)
}
  0x45   :  { %s721_s3 = smov 256   ;;  %s722_s11 = smov 16  }
  0x46   :  { %66 = dma.hbm_to_vmem [thread:$0]  %s844_s5, 4096, %s791_s9, [#allocation8], %s721_s3, %s721_s3, %s722_s11  }
  0x47   :  { %707 = dma.done.wait [#allocation3], 256  }
  0x48   :  { %708 = vsyncadd [#allocation3], 4294967040 }
  0x49   :  { %709 = dma.done.wait [#allocation5], 2304  }
  0x4a   :  { %710 = vsyncadd [#allocation5], 4294964992 }
  0x4b   :  { %711 = dma.done.wait [#allocation8], 4096  }
  0x4c   :  { %712 = vsyncadd [#allocation8], 4294963200  ;;  %vm92_vm0 = vcmask 130048   ;;  %v83_v0 = vld [vmem:[#allocation4] sm:$0xff]  ;;  %v84_v1 = vld [vmem:[#allocation4 + $0x8] sm:$0xff] }
  0x4d   :  { %v81_v2 = vld [vmem:[#allocation2] sm:$0xff]  ;;  %v536_v3 = vpack.c.bf16 %v84_v1, %v83_v0  ;;  %v177_v5 = vld [vmem:[#allocation6 + $0x8] sm:$0xff]  ;;  %v178_v7 = vld [vmem:[#allocation6 + $0x10] sm:$0xff] }
  0x4e   :  { %498 = vmatprep.mubr.msk.f32.mxu1 %vm92_vm0, %v81_v2  ;;  %v176_v4 = vld [vmem:[#allocation6] sm:$0xff]  ;;  %v179_v8 = vld [vmem:[#allocation6 + $0x18] sm:$0xff]  ;;  %v82_v9 = vld [vmem:[#allocation2 + $0x8] sm:$0xff] }
  0x4f   :  { %v540_v6 = vpack.c.bf16 %v177_v5, %v176_v4  ;;  %537 = vmatprep.subr.bf16.mxu1 %v536_v3  ;;  %v544_v10 = vpack.c.bf16 %v179_v8, %v178_v7  ;;  %v180_v11 = vld [vmem:[#allocation6 + $0x20] sm:$0xff]  ;;  %v181_v12 = vld [vmem:[#allocation6 + $0x28] sm:$0xff]  ;;  %v182_v14 = vld [vmem:[#allocation6 + $0x30] sm:$0xff] }
  0x50   :  { %539 = vmatpush3.bf16.msra.mxu1 %v536_v3  ;;  %v548_v13 = vpack.c.bf16 %v181_v12, %v180_v11  ;;  %v183_v15 = vld [vmem:[#allocation6 + $0x38] sm:$0xff]  ;;  %v184_v17 = vld [vmem:[#allocation6 + $0x40] sm:$0xff]  ;;  %v185_v18 = vld [vmem:[#allocation6 + $0x48] sm:$0xff] }
  0x51   :  { %541 = vmatprep.subr.bf16.mxu1 %v540_v6  ;;  %v552_v16 = vpack.c.bf16 %v183_v15, %v182_v14  ;;  %v556_v19 = vpack.c.bf16 %v185_v18, %v184_v17  ;;  %v186_v20 = vld [vmem:[#allocation6 + $0x50] sm:$0xff]  ;;  %v187_v21 = vld [vmem:[#allocation6 + $0x58] sm:$0xff]  ;;  %v188_v23 = vld [vmem:[#allocation6 + $0x60] sm:$0xff] }
  0x52   :  { %v560_v22 = vpack.c.bf16 %v187_v21, %v186_v20  ;;  %v189_v24 = vld [vmem:[#allocation6 + $0x68] sm:$0xff]  ;;  %v190_v26 = vld [vmem:[#allocation6 + $0x70] sm:$0xff]  ;;  %v191_v27 = vld [vmem:[#allocation6 + $0x78] sm:$0xff]  ;;  %v723_v20 = vmov 0.0  }
  0x53   :  { %499 = vmatmul.mubr.msk.f32.vlgmr.msra.gmra.mrb[0].mxu1 %vm92_vm0, %v82_v9  ;;  %v564_v25 = vpack.c.bf16 %v189_v24, %v188_v23  ;;  %v568_v28 = vpack.c.bf16 %v191_v27, %v190_v26  ;;  %v277_v29 = vld [vmem:[#allocation7 + $0x8] sm:$0xff]  ;;  %v279_v30 = vld [vmem:[#allocation7 + $0x18] sm:$0xff]  ;;  %v276_v31 = vld [vmem:[#allocation7] sm:$0xff]  ;;  %384 = vmatprep.mubr.f32.mxu0 %v723_v20 }
  0x54   :  { %543 = vmatpush3.bf16.msra.mxu1 %v540_v6  ;;  %v572_v32 = vpack.c.bf16 %v279_v30, %v277_v29  ;;  %v278_v33 = vld [vmem:[#allocation7 + $0x10] sm:$0xff]  ;;  %v281_v34 = vld [vmem:[#allocation7 + $0x28] sm:$0xff]  ;;  %v283_v35 = vld [vmem:[#allocation7 + $0x38] sm:$0xff] }
  0x55   :  { %545 = vmatprep.subr.bf16.mxu1 %v544_v10  ;;  %v574_v36 = vpack.c.bf16 %v278_v33, %v276_v31  ;;  %v576_v37 = vpack.c.bf16 %v283_v35, %v281_v34  ;;  %v280_v38 = vld [vmem:[#allocation7 + $0x20] sm:$0xff]  ;;  %v282_v39 = vld [vmem:[#allocation7 + $0x30] sm:$0xff]  ;;  %v285_v40 = vld [vmem:[#allocation7 + $0x48] sm:$0xff] }
  0x56   :  { %573 = vmatprep.subr.bf16.mxu0 %v572_v32  ;;  %v287_v41 = vld [vmem:[#allocation7 + $0x58] sm:$0xff]  ;;  %v578_v42 = vpack.c.bf16 %v282_v39, %v280_v38  ;;  %v284_v44 = vld [vmem:[#allocation7 + $0x40] sm:$0xff]  ;;  %v286_v45 = vld [vmem:[#allocation7 + $0x50] sm:$0xff] }
  0x57   :  { %575 = vmatpush1.bf16.msra.mxu0 %v574_v36  ;;  %v580_v43 = vpack.c.bf16 %v287_v41, %v285_v40  ;;  %v289_v46 = vld [vmem:[#allocation7 + $0x68] sm:$0xff]  ;;  %v291_v47 = vld [vmem:[#allocation7 + $0x78] sm:$0xff]  ;;  %v582_v48 = vpack.c.bf16 %v286_v45, %v284_v44  ;;  %v288_v50 = vld [vmem:[#allocation7 + $0x60] sm:$0xff] }
  0x58   :  { %547 = vmatpush3.bf16.msra.mxu1 %v544_v10  ;;  %577 = vmatprep.subr.bf16.mxu0 %v576_v37  ;;  %v584_v49 = vpack.c.bf16 %v291_v47, %v289_v46  ;;  %v290_v51 = vld [vmem:[#allocation7 + $0x70] sm:$0xff]  ;;  %v293_v52 = vld [vmem:[#allocation7 + $0x88] sm:$0xff]  ;;  %v295_v53 = vld [vmem:[#allocation7 + $0x98] sm:$0xff] }
  0x59   :  { %549 = vmatprep.subr.bf16.mxu1 %v548_v13  ;;  %v586_v54 = vpack.c.bf16 %v290_v51, %v288_v50  ;;  %v588_v55 = vpack.c.bf16 %v295_v53, %v293_v52  ;;  %v292_v56 = vld [vmem:[#allocation7 + $0x80] sm:$0xff]  ;;  %v294_v57 = vld [vmem:[#allocation7 + $0x90] sm:$0xff]  ;;  %v297_v58 = vld [vmem:[#allocation7 + $0xa8] sm:$0xff] }
  0x5a   :  { %v299_v59 = vld [vmem:[#allocation7 + $0xb8] sm:$0xff]  ;;  %v590_v60 = vpack.c.bf16 %v294_v57, %v292_v56  ;;  %v296_v62 = vld [vmem:[#allocation7 + $0xa0] sm:$0xff]  ;;  %v298_v63 = vld [vmem:[#allocation7 + $0xb0] sm:$0xff] }
  0x5b   :  { %579 = vmatpush1.bf16.msra.mxu0 %v578_v42  ;;  %v592_v61 = vpack.c.bf16 %v299_v59, %v297_v58  ;;  %v301_v0 = vld [vmem:[#allocation7 + $0xc8] sm:$0xff]  ;;  %v303_v1 = vld [vmem:[#allocation7 + $0xd8] sm:$0xff]  ;;  %v594_v2 = vpack.c.bf16 %v298_v63, %v296_v62  ;;  %v300_v4 = vld [vmem:[#allocation7 + $0xc0] sm:$0xff] }
  0x5c   :  { %551 = vmatpush3.bf16.msra.mxu1 %v548_v13  ;;  %581 = vmatprep.subr.bf16.mxu0 %v580_v43  ;;  %v596_v3 = vpack.c.bf16 %v303_v1, %v301_v0  ;;  %v302_v5 = vld [vmem:[#allocation7 + $0xd0] sm:$0xff]  ;;  %v468_v7 = vld [vmem:[%s841_s2] ss:$0 sm:$0xff]  ;;  %v305_v14 = vld [vmem:[#allocation7 + $0xe8] sm:$0xff] }
  0x5d   :  { %553 = vmatprep.subr.bf16.mxu1 %v552_v16  ;;  %v598_v6 = vpack.c.bf16 %v302_v5, %v300_v4  ;;  %v307_v15 = vld [vmem:[#allocation7 + $0xf8] sm:$0xff]  ;;  %v304_v17 = vld [vmem:[#allocation7 + $0xe0] sm:$0xff]  ;;  %v306_v18 = vld [vmem:[#allocation7 + $0xf0] sm:$0xff] }
  0x5e   :  { %v471_v21 = vld [vmem:[%s843_s4] ss:$0 sm:$0xff] }
  0x5f   :  { %583 = vmatpush1.bf16.msra.mxu0 %v582_v48  ;;  %v308_v31 = vld [vmem:[%s845_s6] sm:$0x3] }
  0x60   :  { %555 = vmatpush3.bf16.msra.mxu1 %v552_v16  ;;  %585 = vmatprep.subr.bf16.mxu0 %v584_v49  ;;  %v600_v16 = vpack.c.bf16 %v307_v15, %v305_v14 }
  0x61   :  { %557 = vmatprep.subr.bf16.mxu1 %v556_v19 }
  0x63   :  { %587 = vmatpush1.bf16.msra.mxu0 %v586_v54 }
  0x64   :  { %559 = vmatpush3.bf16.msra.mxu1 %v556_v19  ;;  %589 = vmatprep.subr.bf16.mxu0 %v588_v55  ;;  %v602_v19 = vpack.c.bf16 %v306_v18, %v304_v17 }
  0x65   :  { %561 = vmatprep.subr.bf16.mxu1 %v560_v22 }
  0x67   :  { %591 = vmatpush1.bf16.msra.mxu0 %v590_v60 }
  0x68   :  { %563 = vmatpush3.bf16.msra.mxu1 %v560_v22  ;;  %593 = vmatprep.subr.bf16.mxu0 %v592_v61 }
  0x69   :  { %565 = vmatprep.subr.bf16.mxu1 %v564_v25 }
  0x6b   :  { %595 = vmatpush1.bf16.msra.mxu0 %v594_v2 }
  0x6c   :  { %567 = vmatpush3.bf16.msra.mxu1 %v564_v25  ;;  %597 = vmatprep.subr.bf16.mxu0 %v596_v3 }
  0x6d   :  { %569 = vmatprep.subr.bf16.mxu1 %v568_v28 }
  0x6f   :  { %599 = vmatpush1.bf16.msra.mxu0 %v598_v6 }
  0x70   :  { %571 = vmatpush3.bf16.msra.mxu1 %v568_v28  ;;  %601 = vmatprep.subr.bf16.mxu0 %v600_v16  ;;  %v310_v28 = vlaneseq }
  0x72   :  { %v311_v29 = vshrl.u32 %v310_v28, 7 }
  0x73   :  { %603 = vmatpush1.bf16.msra.mxu0 %v602_v19 }
  0x74   :  { %v312_v30 = vsub.s32 0, %v311_v29  ;;  %v316_v32 = vsub.s32 1, %v311_v29 }
  0x76   :  { %v313_v33 = vrot.slane %v308_v31, %v312_v30  ;;  %v317_v34 = vrot.slane %v308_v31, %v316_v32 }
 0x126   :  { %v500_v8 = vpop.f32.mrb[0].mxu1 }
 0x127   :  { %v171_v9 = vadd.f32 %v500_v8, %v468_v7  ;;  %v165_v10 = vpop.f32.mrb[1].mxu1 }
 0x128   :  { %v166_v11 = vadd.f32 %v468_v7, %v165_v10 }
 0x129   :  { %v175_v13 = vmax.f32 %v171_v9, 0.0 }
 0x12a   :  { %v174_v12 = vmax.f32 %v166_v11, 0.0 }
 0x12c   :  { %533 = vmatprep.mubr.f32.mxu1 %v174_v12 }
 0x12d   :  { %534 = vmatmul.mubr.f32.vlgmr.msra.gmra.mrb[2].mxu1 %v175_v13 }
 0x200   :  { %v535_v22 = vpop.f32.mrb[2].mxu1 }
 0x201   :  { %v265_v23 = vpop.f32.mrb[3].mxu1  ;;  %v271_v25 = vadd.f32 %v535_v22, %v471_v21 }
 0x202   :  { %v266_v24 = vadd.f32 %v471_v21, %v265_v23 }
 0x203   :  { %v275_v27 = vmax.f32 %v271_v25, 0.0 }
 0x204   :  { %v274_v26 = vmax.f32 %v266_v24, 0.0 }
 0x206   :  { %385 = vmatmul.mubr.f32.vlgmr.msra.gmra.mrb[0].mxu0 %v274_v26 }
 0x207   :  { %390 = vmatprep.mubr.f32.mxu0 %v723_v20 }
 0x20a   :  { %391 = vmatmul.mubr.f32.gmra.mrb[2].mxu0 %v275_v27 }
 0x2d9   :  { %v386_v35 = vpop.f32.mrb[0].mxu0 }
 0x2da   :  { %v387_v36 = vadd.f32 %v386_v35, %v313_v33  ;;  %v388_v37 = vpop.f32.mrb[1].mxu0 }
 0x2db   :  { %v389_v38 = vadd.f32 %v388_v37, %v317_v34 }
 0x2dc   :  { %407 = vst [vmem:[#allocation9] sm:$0xf] %v387_v36 }
 0x2dd   :  { %v397_v39 = vmax.f32 %v389_v38, -20.0  ;;  %v392_v40 = vpop.f32.mrb[2].mxu0 }
 0x2de   :  { %v394_v41 = vpop.f32.mrb[3].mxu0 }
 0x2df   :  { %v399_v42 = vmin.f32 %v397_v39, 2.0  ;;  %v395_v43 = vadd.f32 %v394_v41, %v317_v34 }
 0x2e1   :  { %v411_v44 = vmul.f32 1.442695, %v399_v42  ;;  %v398_v45 = vmax.f32 %v395_v43, -20.0 }
 0x2e3   :  { %615 = vpow2.f32 %v411_v44  ;;  %v400_v46 = vmin.f32 %v398_v45, 2.0 }
 0x2e5   :  { %v413_v47 = vmul.f32 1.442695, %v400_v46 }
 0x2e7   :  { %617 = vpow2.f32 %v413_v47 }
 0x2ed   :  { %v616_v48 = vpop.eup %615 }
 0x2ee   :  { %421 = vst [vmem:[#allocation9 + $0x4] sm:$0xf] %v616_v48 }
 0x2f1   :  { %v618_v49 = vpop.eup %617 }
 0x2f5   :  { %v454_v50 = vld [vmem:[#allocation9] sm:$0xff] }
 0x2f6   :  { %455 = vst [vmem:[%s846_s7] sm:$0xff] %v454_v50 }
 0x2f7   :  { %461 = vsyncpa [#allocation3], 1 }
 0x2f8   :  { %462 = vsyncpa [#allocation5], 1 }
 0x2f9   :  { %463 = vsyncpa [#allocation8], 1 }

</bundles_post_ra>
